<compile_context>
chip_gen: v7x
topology: tpu7x:2x2x1
jax: 0.10.0
libtpu: 0.0.40
codegen_flags: <defaults>
</compile_context>

<pallas_src>
import functools

import jax
import jax.numpy as jnp
from jax.experimental import pallas as pl
from jax.experimental.pallas import tpu as pltpu

EMB_DIM = 8
NUM_FEATS = 5
NUM_PAD = 8        # numeric contraction slab padded 5 -> 8
HIDDEN = 128


def _round_up(x, m):
    return ((x + m - 1) // m) * m


def mlp_emb_kernel(idx_ref, xnum_ref, w_fused_ref, w2_ref, b2_ref, out_ref):
    """One batch tile: [one-hot(noc|sport) | numeric] @ W_fused -> relu -> fc2."""
    tb = idx_ref.shape[0]
    vt = w_fused_ref.shape[0]          # v_pad + NUM_PAD
    v_pad = vt - NUM_PAD

    noc = idx_ref[:, 0:1]              # (TB, 1) int32
    sport = idx_ref[:, 1:2]            # (TB, 1) int32, pre-offset by num_noc

    # Combined one-hot over the stacked (noc | sport) vocabulary.  The two hits
    # are disjoint because sport indices were offset in the wrapper.
    iota = jax.lax.broadcasted_iota(jnp.int32, (tb, v_pad), 1)
    oh = jnp.logical_or(iota == noc, iota == sport).astype(jnp.float32)

    # Single fused LHS (one-hot columns + numeric columns) -> ONE fc1 matmul.
    # b1 is folded into the noc rows of w_fused, so no bias add is needed here.
    lhs = jnp.concatenate([oh, xnum_ref[...]], axis=1)        # (TB, vt)
    h = jnp.dot(lhs, w_fused_ref[...], preferred_element_type=jnp.float32)
    h = jnp.maximum(h, 0.0)                                   # ReLU

    # fc2 into the narrow (8-lane padded) output tile.
    out_ref[...] = (jnp.dot(h, w2_ref[...], preferred_element_type=jnp.float32)
                    + b2_ref[...])


def prepare_params(params):
    """One-time parameter prep: fold embeddings + b1 into fc1, stack numeric slab, pad."""
    noc_tbl, sport_tbl, w1, b1, w2, b2 = params
    num_noc = int(noc_tbl.shape[0])
    num_sport = int(sport_tbl.shape[0])
    output_size = int(w2.shape[0])

    w1_t = jnp.transpose(w1).astype(jnp.float32)          # (21, 128)
    w2_t = jnp.transpose(w2).astype(jnp.float32)          # (128, out)
    b1_f = b1.astype(jnp.float32)

    # Fold embedding tables through fc1's row-slices; fold b1 into the noc rows
    # (every real row fires exactly one noc column).
    w_noc = noc_tbl.astype(jnp.float32) @ w1_t[0:EMB_DIM, :] + b1_f[None, :]
    w_sport = sport_tbl.astype(jnp.float32) @ w1_t[EMB_DIM:2 * EMB_DIM, :]

    v = num_noc + num_sport
    v_pad = _round_up(v, 8)
    vt = v_pad + NUM_PAD                                   # numeric slab stacked below
    w_fused = jnp.zeros((vt, HIDDEN), jnp.float32)
    w_fused = (w_fused.at[:num_noc].set(w_noc)
                      .at[num_noc:v].set(w_sport)
                      .at[v_pad:v_pad + NUM_FEATS].set(
                          w1_t[2 * EMB_DIM:2 * EMB_DIM + NUM_FEATS, :]))

    # Narrow output: pad columns only to a multiple of 8 (block dim == full dim).
    out_pad = _round_up(max(output_size, 1), 8)
    w2_pad = jnp.zeros((HIDDEN, out_pad), jnp.float32).at[:, :output_size].set(w2_t)
    b2_pad = jnp.zeros((1, out_pad), jnp.float32).at[:, :output_size].set(
        b2.astype(jnp.float32))

    return dict(w_fused=w_fused, w2=w2_pad, b2=b2_pad,
                num_noc=num_noc, output_size=output_size)


@functools.partial(jax.jit, static_argnames=("num_noc", "output_size", "tile_b"))
def _forward(x_noc, x_sport, x_numeric, w_fused, w2, b2,
             *, num_noc, output_size, tile_b):
    B = x_noc.shape[0]
    vt, hidden = w_fused.shape
    out_pad = w2.shape[1]

    # Pack both index streams into one (B, 2) int32 block; pre-offset sport.
    idx = jnp.stack([x_noc.astype(jnp.int32),
                     x_sport.astype(jnp.int32) + num_noc], axis=1)
    xnum = x_numeric.astype(jnp.float32)
    xnum = jnp.pad(xnum, ((0, 0), (0, NUM_PAD - xnum.shape[1])))

    # Batch tiling: TB rows per grid step (multiple of 8), ragged tail zero-padded.
    b8 = _round_up(B, 8)
    TB = min(_round_up(tile_b, 8), b8)
    if b8 >= 16:
        # Keep >= 2 grid steps so v7x's two TensorCores both get work.
        TB = min(TB, _round_up(pl.cdiv(b8, 2), 8))
    b_pad = _round_up(b8, TB)
    if b_pad != B:
        pad = ((0, b_pad - B), (0, 0))
        idx = jnp.pad(idx, pad)       # tail rows hit noc col 0 -> garbage, sliced off
        xnum = jnp.pad(xnum, pad)

    row = lambda i: (i, 0)     # batch-tiled operands
    const = lambda i: (0, 0)   # weights/biases: VMEM-resident across all steps

    out = pl.pallas_call(
        mlp_emb_kernel,
        out_shape=jax.ShapeDtypeStruct((b_pad, out_pad), jnp.float32),
        grid=(b_pad // TB,),
        in_specs=[
            pl.BlockSpec((TB, 2), row),            # packed (noc, sport+off) indices
            pl.BlockSpec((TB, NUM_PAD), row),      # numeric features (padded to 8)
            pl.BlockSpec((vt, hidden), const),     # fused [emb|numeric] fc1 weight (+b1)
            pl.BlockSpec((hidden, out_pad), const),
            pl.BlockSpec((1, out_pad), const),     # b2 (8-lane padded)
        ],
        out_specs=pl.BlockSpec((TB, out_pad), row),
        compiler_params=pltpu.CompilerParams(
            dimension_semantics=("parallel",)),
    )(idx, xnum, w_fused, w2, b2)

    return out[:B, :output_size]


def mlp_with_embeddings(x_noc, x_sport, x_numeric, prepared, *, tile_b=4096):
    return _forward(x_noc, x_sport, x_numeric,
                    prepared["w_fused"], prepared["w2"], prepared["b2"],
                    num_noc=prepared["num_noc"],
                    output_size=prepared["output_size"],
                    tile_b=tile_b)


def init_params(key, num_noc, num_sport, output_size):
    """Deterministic parameter init mimicking PyTorch defaults (shapes are what matter)."""
    k = jax.random.split(key, 6)
    in1, out1 = EMB_DIM + EMB_DIM + NUM_FEATS, HIDDEN
    noc_tbl = jax.random.normal(k[0], (num_noc, EMB_DIM), jnp.float32)
    sport_tbl = jax.random.normal(k[1], (num_sport, EMB_DIM), jnp.float32)
    lim1 = 1.0 / jnp.sqrt(in1)
    w1 = jax.random.uniform(k[2], (out1, in1), jnp.float32, -lim1, lim1)
    b1 = jax.random.uniform(k[3], (out1,), jnp.float32, -lim1, lim1)
    lim2 = 1.0 / jnp.sqrt(out1)
    w2 = jax.random.uniform(k[4], (output_size, out1), jnp.float32, -lim2, lim2)
    b2 = jax.random.uniform(k[5], (output_size,), jnp.float32, -lim2, lim2)
    return noc_tbl, sport_tbl, w1, b1, w2, b2


if __name__ == "__main__":
    num_noc, num_sport, output_size = 16, 10, 4

    key = jax.random.PRNGKey(0)
    kp = jax.random.fold_in(key, 1000)
    params = init_params(kp, num_noc, num_sport, output_size)
    prepared = prepare_params(params)

    noc_tbl, sport_tbl, w1, b1, w2, b2 = params

    def ref_forward(xn, xs, xq):
        x = jnp.concatenate([noc_tbl[xn], sport_tbl[xs], xq], axis=1)
        return jnp.maximum(x @ w1.T + b1, 0.0) @ w2.T + b2

    # (B, tile_b): small single-tile case and a ragged multi-grid-step case.
    for B, tile_b in ((8, 4096), (37, 16)):
        ka, kb, kc = jax.random.split(jax.random.fold_in(key, B), 3)
        x_noc = jax.random.randint(ka, (B,), 0, num_noc, dtype=jnp.int32)
        x_sport = jax.random.randint(kb, (B,), 0, num_sport, dtype=jnp.int32)
        x_numeric = jax.random.normal(kc, (B, NUM_FEATS), jnp.float32)

        out = mlp_with_embeddings(x_noc, x_sport, x_numeric, prepared, tile_b=tile_b)
        out = jax.block_until_ready(out)

        ref = ref_forward(x_noc, x_sport, x_numeric)
        assert out.shape == (B, output_size), out.shape
        assert jnp.allclose(out, ref, atol=1e-4, rtol=1e-4), float(
            jnp.max(jnp.abs(out - ref)))

    print("KERNEL_OK")
</pallas_src>

<mosaic_0001>
module attributes {stable_mosaic.version = 11 : i64} {
  func.func @mlp_emb_kernel(%arg0: i32, %arg1: memref<8x2xi32, #tpu.memory_space<vmem>>, %arg2: memref<8x8xf32, #tpu.memory_space<vmem>>, %arg3: memref<40x128xf32, #tpu.memory_space<vmem>>, %arg4: memref<128x8xf32, #tpu.memory_space<vmem>>, %arg5: memref<1x8xf32, #tpu.memory_space<vmem>>, %arg6: memref<8x8xf32, #tpu.memory_space<vmem>>) attributes {dimension_semantics = [#tpu.dimension_semantics<parallel>], iteration_bounds = array<i64: 1>, scalar_prefetch = 0 : i64, scratch_operands = 0 : i64, tpu.core_type = #tpu.core_type<tc>, window_params = [{transform_indices = @transform_0, window_bounds = array<i64: 8, 2>}, {transform_indices = @transform_1, window_bounds = array<i64: 8, 8>}, {pipeline_mode = #tpu.pipeline_mode<synchronous>, transform_indices = @transform_2, window_bounds = array<i64: 40, 128>}, {pipeline_mode = #tpu.pipeline_mode<synchronous>, transform_indices = @transform_3, window_bounds = array<i64: 128, 8>}, {pipeline_mode = #tpu.pipeline_mode<synchronous>, transform_indices = @transform_4, window_bounds = array<i64: 1, 8>}, {transform_indices = @transform_5, window_bounds = array<i64: 8, 8>}]} {
    %c0 = arith.constant 0 : index
    %c0_0 = arith.constant 0 : index
    %0 = vector.load %arg1[%c0, %c0_0] : memref<8x2xi32, #tpu.memory_space<vmem>>, vector<8x1xi32>
    %c0_1 = arith.constant 0 : index
    %c1 = arith.constant 1 : index
    %1 = vector.load %arg1[%c0_1, %c1] : memref<8x2xi32, #tpu.memory_space<vmem>>, vector<8x1xi32>
    %2 = tpu.iota {dimensions = array<i32: 1>} : vector<8x32xi32>
    %3 = vector.broadcast %0 : vector<8x1xi32> to vector<8x32xi32>
    %4 = arith.cmpi eq, %2, %3 : vector<8x32xi32>
    %5 = vector.broadcast %1 : vector<8x1xi32> to vector<8x32xi32>
    %6 = arith.cmpi eq, %2, %5 : vector<8x32xi32>
    %7 = arith.ori %4, %6 : vector<8x32xi1>
    %8 = arith.extui %7 : vector<8x32xi1> to vector<8x32xi32>
    %9 = arith.sitofp %8 : vector<8x32xi32> to vector<8x32xf32>
    %c0_2 = arith.constant 0 : index
    %c0_3 = arith.constant 0 : index
    %10 = vector.load %arg2[%c0_2, %c0_3] : memref<8x8xf32, #tpu.memory_space<vmem>>, vector<8x8xf32>
    %11 = tpu.concatenate %9, %10 in 1 : vector<8x32xf32>, vector<8x8xf32> -> vector<8x40xf32>
    %c0_4 = arith.constant 0 : index
    %c0_5 = arith.constant 0 : index
    %12 = vector.load %arg3[%c0_4, %c0_5] : memref<40x128xf32, #tpu.memory_space<vmem>>, vector<40x128xf32>
    %cst = arith.constant dense<0.000000e+00> : vector<8x128xf32>
    %13 = tpu.matmul %11, %12, %cst {dimension_numbers = #tpu.dot_dimension_numbers<[1], [0], [0], [1], [0, 0, 1, 1], [], []>} : vector<8x40xf32>, vector<40x128xf32>, vector<8x128xf32> -> vector<8x128xf32>
    %cst_6 = arith.constant 0.000000e+00 : f32
    %14 = vector.broadcast %cst_6 : f32 to vector<8x128xf32>
    %15 = arith.maximumf %13, %14 : vector<8x128xf32>
    %c0_7 = arith.constant 0 : index
    %c0_8 = arith.constant 0 : index
    %16 = vector.load %arg4[%c0_7, %c0_8] : memref<128x8xf32, #tpu.memory_space<vmem>>, vector<128x8xf32>
    %cst_9 = arith.constant dense<0.000000e+00> : vector<8x8xf32>
    %17 = tpu.matmul %15, %16, %cst_9 {dimension_numbers = #tpu.dot_dimension_numbers<[1], [0], [0], [1], [0, 0, 1, 1], [], []>} : vector<8x128xf32>, vector<128x8xf32>, vector<8x8xf32> -> vector<8x8xf32>
    %c0_10 = arith.constant 0 : index
    %c0_11 = arith.constant 0 : index
    %18 = vector.load %arg5[%c0_10, %c0_11] : memref<1x8xf32, #tpu.memory_space<vmem>>, vector<1x8xf32>
    %19 = vector.broadcast %18 : vector<1x8xf32> to vector<8x8xf32>
    %20 = arith.addf %17, %19 : vector<8x8xf32>
    %c0_12 = arith.constant 0 : index
    %c0_13 = arith.constant 0 : index
    %21 = vector.load %arg6[%c0_12, %c0_13] : memref<8x8xf32, #tpu.memory_space<vmem>>, vector<8x8xf32>
    tpu.vector_store %arg6[%c0_12, %c0_13], %20 {strides = array<i32>} : memref<8x8xf32, #tpu.memory_space<vmem>>, vector<8x8xf32>,
    return
  }
  func.func @transform_0(%arg0: i32) -> (i32, i32) {
    %c0_i32 = arith.constant 0 : i32
    %c0_i32_0 = arith.constant 0 : i32
    return %arg0, %c0_i32 : i32, i32
  }
  func.func @transform_1(%arg0: i32) -> (i32, i32) {
    %c0_i32 = arith.constant 0 : i32
    %c0_i32_0 = arith.constant 0 : i32
    return %arg0, %c0_i32 : i32, i32
  }
  func.func @transform_2(%arg0: i32) -> (i32, i32) {
    %c0_i32 = arith.constant 0 : i32
    %c0_i32_0 = arith.constant 0 : i32
    %c0_i32_1 = arith.constant 0 : i32
    return %c0_i32, %c0_i32_0 : i32, i32
  }
  func.func @transform_3(%arg0: i32) -> (i32, i32) {
    %c0_i32 = arith.constant 0 : i32
    %c0_i32_0 = arith.constant 0 : i32
    %c0_i32_1 = arith.constant 0 : i32
    return %c0_i32, %c0_i32_0 : i32, i32
  }
  func.func @transform_4(%arg0: i32) -> (i32, i32) {
    %c0_i32 = arith.constant 0 : i32
    %c0_i32_0 = arith.constant 0 : i32
    %c0_i32_1 = arith.constant 0 : i32
    return %c0_i32, %c0_i32_0 : i32, i32
  }
  func.func @transform_5(%arg0: i32) -> (i32, i32) {
    %c0_i32 = arith.constant 0 : i32
    %c0_i32_0 = arith.constant 0 : i32
    return %arg0, %c0_i32 : i32, i32
  }
}

</mosaic_0001>

<bundles_post_ra>
// kernel: _forward.1
= control target key start
LH: loop header
LB: loop body
LE: loop exit
PB: predicated region body
PF: predicated region fallthrough
CT: control target
= control target key end

     0   :  { %v332_v0 = vmov 0   ;;  %v333_v3 = vmov 0.0|0.0   ;;  %s334_s24 = smov 32   ;;  %v335_v10 = vmov 1   ;;  %v336_v11 = vmov 0.0   ;;  %s443_s0 = inlined_call_operand.vmem [shape: s32[8,2], index: 0, kind: input, shape index: {}]   ;;  %s444_s1 = inlined_call_operand.vmem [shape: f32[8,8], index: 1, kind: input, shape index: {}]   ;;  %s445_s2 = inlined_call_operand.vmem [shape: f32[40,128], index: 2, kind: input, shape index: {}]   ;;  %s446_s3 = inlined_call_operand.vmem [shape: f32[128,8], index: 3, kind: input, shape index: {}]   ;;  %s447_s4 = inlined_call_operand.vmem [shape: f32[1,8], index: 4, kind: input, shape index: {}]   ;;  %s448_s5 = inlined_call_operand.vmem [shape: f32[8,8], index: 5, kind: output, shape index: {}]  }
   0x1   :  { %330 = vset.pattern.permute.xlu0 %v332_v0  ;;  %v20_v1 = vld [vmem:[%s443_s0] sm:$0xff]  ;;  %294 = vmatprep.subr.bf16.mxu0 %v333_v3  ;;  %v42_v5 = vld [vmem:[%s445_s2 + $0x8] sm:$0xff]  ;;  %v43_v6 = vld [vmem:[%s445_s2 + $0x10] sm:$0xff]  ;;  %vm337_vm0 = vmmov 0   ;;  %v21_v34 = vlaneseq  ;;  %vm39_vm3 = vcmask 261120   ;;  %vm46_vm5 = vcmask 326656  }
   0x2   :  { %v34_v2 = vld [vmem:[%s444_s1] sm:$0xff]  ;;  %24 = vperm.xlu0 %330, %v20_v1   ;;  %v44_v7 = vld [vmem:[%s445_s2 + $0x18] sm:$0xff]  ;;  %300 = vmatprep.subr.bf16.mxu1 %v333_v3  ;;  %v122_v14 = vld [vmem:[%s446_s3 + $0x8] sm:$0xff]  ;;  %vm214_vm6 = vcmask 64512  }
   0x3   :  { %v41_v4 = vld [vmem:[%s445_s2] sm:$0xff]  ;;  %36 = vrot.lane.b32.xlu1 %v34_v2, %s334_s24  ;;  %v298_v9 = vpack.c.bf16 %v44_v7, %v43_v6  ;;  %256 = vmatprep.mubr.msk.f32.mxu0 %vm337_vm0, %v336_v11  ;;  %v123_v15 = vld [vmem:[%s446_s3 + $0x10] sm:$0xff]  ;;  %v124_v17 = vld [vmem:[%s446_s3 + $0x18] sm:$0xff]  ;;  %v22_v36 = vand.u32 127, %v21_v34 }
   0x4   :  { %v295_v8 = vpack.c.bf16 %v42_v5, %v41_v4  ;;  %v45_v12 = vld [vmem:[%s445_s2 + $0x20] sm:$0xff]  ;;  %291 = vmatprep.mubr.msk.f32.mxu1 %vm337_vm0, %v336_v11  ;;  %v304_v18 = vpack.c.bf16 %v124_v17, %v123_v15  ;;  %v126_v20 = vld [vmem:[%s446_s3 + $0x28] sm:$0xff]  ;;  %v127_v22 = vld [vmem:[%s446_s3 + $0x30] sm:$0xff] }
   0x5   :  { %v121_v13 = vld [vmem:[%s446_s3] sm:$0xff]  ;;  %v128_v23 = vld [vmem:[%s446_s3 + $0x38] sm:$0xff]  ;;  %v130_v26 = vld [vmem:[%s446_s3 + $0x48] sm:$0xff] }
   0x6   :  { %296 = vmatpush3.bf16.msra.mxu0 %v295_v8  ;;  %331 = vset.pattern.permute.xlu0 %v335_v10  ;;  %v301_v16 = vpack.c.bf16 %v122_v14, %v121_v13  ;;  %v125_v19 = vld [vmem:[%s446_s3 + $0x20] sm:$0xff]  ;;  %v310_v24 = vpack.c.bf16 %v128_v23, %v127_v22  ;;  %v131_v28 = vld [vmem:[%s446_s3 + $0x50] sm:$0xff]  ;;  %v132_v29 = vld [vmem:[%s446_s3 + $0x58] sm:$0xff] }
   0x7   :  { %297 = vmatprep.subr.bf16.mxu0 %v333_v3  ;;  %28 = vperm.xlu0 %331, %v20_v1   ;;  %v307_v21 = vpack.c.bf16 %v126_v20, %v125_v19  ;;  %v129_v25 = vld [vmem:[%s446_s3 + $0x40] sm:$0xff]  ;;  %v316_v30 = vpack.c.bf16 %v132_v29, %v131_v28  ;;  %v134_v32 = vld [vmem:[%s446_s3 + $0x68] sm:$0xff]  ;;  %v135_v41 = vld [vmem:[%s446_s3 + $0x70] sm:$0xff] }
   0x8   :  { %302 = vmatpush3.bf16.msra.mxu1 %v301_v16  ;;  %v313_v27 = vpack.c.bf16 %v130_v26, %v129_v25  ;;  %v133_v31 = vld [vmem:[%s446_s3 + $0x60] sm:$0xff]  ;;  %v136_v42 = vld [vmem:[%s446_s3 + $0x78] sm:$0xff] }
   0x9   :  { %303 = vmatprep.subr.bf16.mxu1 %v333_v3  ;;  %v319_v33 = vpack.c.bf16 %v134_v32, %v133_v31  ;;  %v322_v43 = vpack.c.bf16 %v136_v42, %v135_v41  ;;  %v222_v47 = vld [vmem:[%s447_s4] ss:$0 sm:$0xff] }
   0xa   :  { %299 = vmatpush3.bf16.msra.mxu0 %v298_v9 }
   0xb   :  { %254 = vmatprep.subr.mxu0 %v336_v11 }
   0xc   :  { %305 = vmatpush3.bf16.msra.mxu1 %v304_v18 }
   0xd   :  { %306 = vmatprep.subr.bf16.mxu1 %v333_v3 }
   0xe   :  { %255 = vmatpush3.msra.mxu0 %v45_v12 }
  0x10   :  { %308 = vmatpush3.bf16.msra.mxu1 %v307_v21 }
  0x11   :  { %309 = vmatprep.subr.bf16.mxu1 %v333_v3 }
  0x14   :  { %311 = vmatpush3.bf16.msra.mxu1 %v310_v24 }
  0x15   :  { %312 = vmatprep.subr.bf16.mxu1 %v333_v3 }
  0x18   :  { %314 = vmatpush3.bf16.msra.mxu1 %v313_v27 }
  0x19   :  { %315 = vmatprep.subr.bf16.mxu1 %v333_v3 }
  0x1c   :  { %317 = vmatpush3.bf16.msra.mxu1 %v316_v30 }
  0x1d   :  { %318 = vmatprep.subr.bf16.mxu1 %v333_v3 }
  0x20   :  { %320 = vmatpush3.bf16.msra.mxu1 %v319_v33 }
  0x21   :  { %321 = vmatprep.subr.bf16.mxu1 %v333_v3 }
  0x24   :  { %323 = vmatpush3.bf16.msra.mxu1 %v322_v43 }
  0x75   :  { %v37_v38 = vpop.permute.xlu1 %36 }
  0x81   :  { %v25_v35 = vpop.permute.xlu0 %24 }
  0x82   :  { %vm26_vm1 = vcmp.eq.s32.totalorder %v22_v36, %v25_v35 }
  0x86   :  { %v29_v37 = vpop.permute.xlu0 %28 }
  0x87   :  { %vm30_vm2 = vcmp.eq.s32.totalorder %v22_v36, %v29_v37 }
  0x88   :  { %vm31_vm4 = vmor %vm26_vm1, %vm30_vm2 }
  0x89   :  { %v220_v39 = vsel %vm31_vm4, 1.0, %v336_v11 }
  0x8a   :  { %v40_v40 = vsel %vm39_vm3, %v220_v39, %v37_v38 }
  0x8b   :  { %257 = vmatmul.mubr.msk.f32.vlgmr.msra.gmra.mrb[0].mxu0 %vm46_vm5, %v40_v40 }
 0x15e   :  { %v116_v44 = vpop.f32.mrb[0].mxu0 }
 0x15f   :  { %v120_v45 = vmax.f32 %v116_v44, 0.0  ;;  %v258_v46 = vpop.f32.mrb[1].mxu0 }
 0x161   :  { %292 = vmatmul.mubr.f32.vlgmr.msra.gmra.mrb[0].mxu1 %v120_v45 }
 0x234   :  { %v210_v48 = vpop.f32.mrb[0].mxu1 }
 0x235   :  { %v211_v49 = vadd.f32 %v222_v47, %v210_v48  ;;  %v293_v50 = vpop.f32.mrb[1].mxu1 }
 0x237   :  { %215 = vst.msk [vmem:[%s448_s5] sm:$0xff] %vm214_vm6, %v211_v49 }

</bundles_post_ra>
